<compile_context>
chip_gen: v6e
topology: v6e:2x2x1
jax: 0.10.0
libtpu: 0.0.40
codegen_flags: <defaults>
</compile_context>

<pallas_src>
import functools

import jax
import jax.numpy as jnp
from jax.experimental import pallas as pl
from jax.experimental.pallas import tpu as pltpu


def _round_up(x, m):
    return (x + m - 1) // m * m


# ----------------------------------------------------------------------------
# Kernel 1: embedding lookup (row gather)  —  ids [T] -> out [T, H]
#   ids_ref   : SMEM scalar-prefetch ref, flat int32 token ids (padded)
#   w_hbm     : full [V, H] weight table, left in HBM
#   out_ref   : (ROWS, H) VMEM output block for this grid step
#   copy_sems : ROWS DMA semaphores (one per in-flight gathered row)
# ----------------------------------------------------------------------------
def _gather_kernel(ids_ref, w_hbm, out_ref, copy_sems, *, rows):
    step = pl.program_id(0)
    vocab = w_hbm.shape[0]

    copies = []
    for r in range(rows):  # small static unroll (ROWS=8), not unroll-over-T
        idx = jnp.clip(ids_ref[step * rows + r], 0, vocab - 1)  # bounds-safe
        cp = pltpu.make_async_copy(
            w_hbm.at[pl.ds(idx, 1), :],      # one gathered row from HBM
            out_ref.at[pl.ds(r, 1), :],      # straight into the output block
            copy_sems.at[r],
        )
        cp.start()
        copies.append(cp)
    for cp in copies:                        # all ROWS DMAs overlap, then join
        cp.wait()


def embedding_lookup(ids_2d, weight, *, rows_per_step=8):
    """ids_2d: [B, S] integer ids, weight: [V, H] -> [B, S, H]."""
    B, S = ids_2d.shape
    V, H = weight.shape
    T = B * S
    Tp = _round_up(T, rows_per_step)

    ids_flat = ids_2d.reshape(T).astype(jnp.int32)
    if Tp != T:
        ids_flat = jnp.pad(ids_flat, (0, Tp - T))  # pad with id 0; sliced off

    out = pl.pallas_call(
        functools.partial(_gather_kernel, rows=rows_per_step),
        out_shape=jax.ShapeDtypeStruct((Tp, H), weight.dtype),
        grid_spec=pltpu.PrefetchScalarGridSpec(
            num_scalar_prefetch=1,                       # ids -> SMEM
            grid=(Tp // rows_per_step,),
            in_specs=[pl.BlockSpec(memory_space=pl.ANY)],  # weight stays in HBM
            out_specs=pl.BlockSpec((rows_per_step, H), lambda i, ids: (i, 0)),
            scratch_shapes=[pltpu.SemaphoreType.DMA((rows_per_step,))],
        ),
        compiler_params=pltpu.CompilerParams(
            dimension_semantics=("arbitrary",)),
    )(ids_flat, weight)
    return out[:T].reshape(B, S, H)


# ----------------------------------------------------------------------------
# Kernel 2: soft-mask path  —  [T, V] @ [V, H] -> [T, H]  (tiled MXU matmul)
# ----------------------------------------------------------------------------
def _matmul_kernel(x_ref, w_ref, o_ref, acc_ref):
    @pl.when(pl.program_id(2) == 0)
    def _():
        acc_ref[...] = jnp.zeros_like(acc_ref)

    acc_ref[...] += jnp.dot(
        x_ref[...], w_ref[...], preferred_element_type=jnp.float32
    )

    @pl.when(pl.program_id(2) == pl.num_programs(2) - 1)
    def _():
        o_ref[...] = acc_ref[...].astype(o_ref.dtype)


def soft_embedding_matmul(mask_3d, weight, *, tm=None, tn=None, tk=None):
    """mask_3d: [B, S, V] float32, weight: [V, H] -> [B, S, H]."""
    B, S, V = mask_3d.shape
    Vw, H = weight.shape
    assert V == Vw
    M, K, N = B * S, V, H
    x = mask_3d.reshape(M, K)

    # Tile selection:
    #  - tn covers the whole hidden dim (up to 768) so the N grid collapses and
    #    the dominant [M, V] mask operand is streamed from HBM exactly once.
    #  - tm/tk (<=256/512) amortize the ~0.35us per-step overhead while keeping
    #    double-buffered inputs + acc well under the default scoped VMEM on
    #    v5e (16 MiB) / v6e (32 MiB) / v7x (32 MiB of 64 MiB physical).
    tn = tn or min(_round_up(N, 128), 768)
    tm = tm or min(_round_up(M, 8), 256)
    tk = tk or min(_round_up(K, 128), 512)

    # Pad (instead of hard divisibility asserts) so real shapes work,
    # e.g. V = 30522, arbitrary B*S.  Zero padding is exact for matmul.
    Mp, Kp, Np = _round_up(M, tm), _round_up(K, tk), _round_up(N, tn)
    if (Mp, Kp) != (M, K):
        x = jnp.pad(x, ((0, Mp - M), (0, Kp - K)))
    w = weight
    if (Kp, Np) != (K, N):
        w = jnp.pad(w, ((0, Kp - K), (0, Np - N)))

    out = pl.pallas_call(
        _matmul_kernel,
        out_shape=jax.ShapeDtypeStruct((Mp, Np), weight.dtype),
        grid_spec=pltpu.PrefetchScalarGridSpec(
            num_scalar_prefetch=0,
            grid=(Mp // tm, Np // tn, Kp // tk),
            in_specs=[
                pl.BlockSpec((tm, tk), lambda i, j, k: (i, k)),
                pl.BlockSpec((tk, tn), lambda i, j, k: (k, j)),
            ],
            out_specs=pl.BlockSpec((tm, tn), lambda i, j, k: (i, j)),
            scratch_shapes=[pltpu.VMEM((tm, tn), jnp.float32)],
        ),
        compiler_params=pltpu.CompilerParams(
            dimension_semantics=("parallel", "parallel", "arbitrary")
        ),
    )(x, w)
    # TODO(synk): optional bf16 input cast (f32 accumulate) for v6e/v7x MXU rate.
    return out[:M, :N].reshape(B, S, N)


# ----------------------------------------------------------------------------
# Module wrapper (mirrors Embedding_.forward dispatch)
# ----------------------------------------------------------------------------
class EmbeddingPallas:
    def __init__(self, weight):
        self.weight = weight  # [V, H]

    def __call__(self, mask):
        if mask.ndim == 2:
            assert jnp.issubdtype(mask.dtype, jnp.integer)
            return embedding_lookup(mask, self.weight)
        assert mask.dtype == jnp.float32
        return soft_embedding_matmul(mask, self.weight)


if __name__ == "__main__":
    key = jax.random.PRNGKey(0)
    k_w, k_ids, k_soft = jax.random.split(key, 3)

    V, H = 64, 128   # vocab, hidden
    B, S = 2, 8      # batch, sequence

    # Deterministic parameter init (nn.Embedding default N(0,1), shape [V, H]).
    weight = jax.random.normal(k_w, (V, H), dtype=jnp.float32)
    emb = EmbeddingPallas(weight)

    # Path 1: integer token ids [B, S] -> gather
    ids = jax.random.randint(k_ids, (B, S), 0, V, dtype=jnp.int32)
    out_gather = jax.block_until_ready(emb(ids))
    ref_gather = jnp.take(weight, ids.reshape(-1), axis=0).reshape(B, S, H)

    # Path 2: float soft mask [B, S, V] -> matmul with weight
    soft = jax.nn.softmax(
        jax.random.normal(k_soft, (B, S, V), dtype=jnp.float32), axis=-1)
    out_soft = jax.block_until_ready(emb(soft))
    ref_soft = jnp.matmul(soft, weight)

    assert out_gather.shape == (B, S, H) and out_soft.shape == (B, S, H)
    assert jnp.allclose(out_gather, ref_gather, atol=1e-5, rtol=1e-5)
    assert jnp.allclose(out_soft, ref_soft, atol=1e-4, rtol=1e-4)

    print("KERNEL_OK")
</pallas_src>

<mosaic_0001>
module attributes {stable_mosaic.version = 11 : i64} {
  func.func @_gather_kernel(%arg0: i32, %arg1: memref<16xi32, #tpu.memory_space<smem>>, %arg2: memref<64x128xf32, #tpu.memory_space<any>>, %arg3: memref<8x128xf32, #tpu.memory_space<vmem>>, %arg4: memref<8x!tpu.dma_semaphore, #tpu.memory_space<semaphore_mem>>) attributes {dimension_semantics = [#tpu.dimension_semantics<arbitrary>], iteration_bounds = array<i64: 2>, scalar_prefetch = 1 : i64, scratch_operands = 1 : i64, tpu.core_type = #tpu.core_type<tc>, window_params = [{}, {transform_indices = @transform_1, window_bounds = array<i64: 8, 128>}]} {
    %c8_i32 = arith.constant 8 : i32
    %0 = arith.muli %arg0, %c8_i32 : i32
    %c0_i32 = arith.constant 0 : i32
    %1 = arith.addi %0, %c0_i32 : i32
    %2 = arith.index_cast %1 : i32 to index
    %3 = memref.load %arg1[%2] : memref<16xi32, #tpu.memory_space<smem>>
    %c0_i32_0 = arith.constant 0 : i32
    %c63_i32 = arith.constant 63 : i32
    %4 = arith.maxsi %c0_i32_0, %3 : i32
    %5 = arith.minsi %c63_i32, %4 : i32
    %c0_i32_1 = arith.constant 0 : i32
    %c0_i32_2 = arith.constant 0 : i32
    %6 = tpu.memref_slice %arg2[%5, %c0_i32_2] : memref<64x128xf32, #tpu.memory_space<any>> -> memref<1x128xf32, #tpu.memory_space<any>>
    %c0_i32_3 = arith.constant 0 : i32
    %c0_i32_4 = arith.constant 0 : i32
    %7 = tpu.memref_slice %arg3[%c0_i32_3, %c0_i32_4] : memref<8x128xf32, #tpu.memory_space<vmem>> -> memref<1x128xf32, #tpu.memory_space<vmem>>
    %8 = tpu.memref_slice %arg4[%c0_i32_1] : memref<8x!tpu.dma_semaphore, #tpu.memory_space<semaphore_mem>> -> memref<1x!tpu.dma_semaphore, #tpu.memory_space<semaphore_mem>>
    %9 = tpu.memref_squeeze %8 : memref<1x!tpu.dma_semaphore, #tpu.memory_space<semaphore_mem>> -> memref<!tpu.dma_semaphore, #tpu.memory_space<semaphore_mem>>
    tpu.enqueue_dma source(%6 : memref<1x128xf32, #tpu.memory_space<any>>) target(%7 : memref<1x128xf32, #tpu.memory_space<vmem>>) target_semaphore(%9 : memref<!tpu.dma_semaphore, #tpu.memory_space<semaphore_mem>>)
    %c8_i32_5 = arith.constant 8 : i32
    %10 = arith.muli %arg0, %c8_i32_5 : i32
    %c1_i32 = arith.constant 1 : i32
    %11 = arith.addi %10, %c1_i32 : i32
    %12 = arith.index_cast %11 : i32 to index
    %13 = memref.load %arg1[%12] : memref<16xi32, #tpu.memory_space<smem>>
    %c0_i32_6 = arith.constant 0 : i32
    %c63_i32_7 = arith.constant 63 : i32
    %14 = arith.maxsi %c0_i32_6, %13 : i32
    %15 = arith.minsi %c63_i32_7, %14 : i32
    %c1_i32_8 = arith.constant 1 : i32
    %c0_i32_9 = arith.constant 0 : i32
    %16 = tpu.memref_slice %arg2[%15, %c0_i32_9] : memref<64x128xf32, #tpu.memory_space<any>> -> memref<1x128xf32, #tpu.memory_space<any>>
    %c1_i32_10 = arith.constant 1 : i32
    %c0_i32_11 = arith.constant 0 : i32
    %17 = tpu.memref_slice %arg3[%c1_i32_10, %c0_i32_11] : memref<8x128xf32, #tpu.memory_space<vmem>> -> memref<1x128xf32, #tpu.memory_space<vmem>>
    %18 = tpu.memref_slice %arg4[%c1_i32_8] : memref<8x!tpu.dma_semaphore, #tpu.memory_space<semaphore_mem>> -> memref<1x!tpu.dma_semaphore, #tpu.memory_space<semaphore_mem>>
    %19 = tpu.memref_squeeze %18 : memref<1x!tpu.dma_semaphore, #tpu.memory_space<semaphore_mem>> -> memref<!tpu.dma_semaphore, #tpu.memory_space<semaphore_mem>>
    tpu.enqueue_dma source(%16 : memref<1x128xf32, #tpu.memory_space<any>>) target(%17 : memref<1x128xf32, #tpu.memory_space<vmem>>) target_semaphore(%19 : memref<!tpu.dma_semaphore, #tpu.memory_space<semaphore_mem>>)
    %c8_i32_12 = arith.constant 8 : i32
    %20 = arith.muli %arg0, %c8_i32_12 : i32
    %c2_i32 = arith.constant 2 : i32
    %21 = arith.addi %20, %c2_i32 : i32
    %22 = arith.index_cast %21 : i32 to index
    %23 = memref.load %arg1[%22] : memref<16xi32, #tpu.memory_space<smem>>
    %c0_i32_13 = arith.constant 0 : i32
    %c63_i32_14 = arith.constant 63 : i32
    %24 = arith.maxsi %c0_i32_13, %23 : i32
    %25 = arith.minsi %c63_i32_14, %24 : i32
    %c2_i32_15 = arith.constant 2 : i32
    %c0_i32_16 = arith.constant 0 : i32
    %26 = tpu.memref_slice %arg2[%25, %c0_i32_16] : memref<64x128xf32, #tpu.memory_space<any>> -> memref<1x128xf32, #tpu.memory_space<any>>
    %c2_i32_17 = arith.constant 2 : i32
    %c0_i32_18 = arith.constant 0 : i32
    %27 = tpu.memref_slice %arg3[%c2_i32_17, %c0_i32_18] : memref<8x128xf32, #tpu.memory_space<vmem>> -> memref<1x128xf32, #tpu.memory_space<vmem>>
    %28 = tpu.memref_slice %arg4[%c2_i32_15] : memref<8x!tpu.dma_semaphore, #tpu.memory_space<semaphore_mem>> -> memref<1x!tpu.dma_semaphore, #tpu.memory_space<semaphore_mem>>
    %29 = tpu.memref_squeeze %28 : memref<1x!tpu.dma_semaphore, #tpu.memory_space<semaphore_mem>> -> memref<!tpu.dma_semaphore, #tpu.memory_space<semaphore_mem>>
    tpu.enqueue_dma source(%26 : memref<1x128xf32, #tpu.memory_space<any>>) target(%27 : memref<1x128xf32, #tpu.memory_space<vmem>>) target_semaphore(%29 : memref<!tpu.dma_semaphore, #tpu.memory_space<semaphore_mem>>)
    %c8_i32_19 = arith.constant 8 : i32
    %30 = arith.muli %arg0, %c8_i32_19 : i32
    %c3_i32 = arith.constant 3 : i32
    %31 = arith.addi %30, %c3_i32 : i32
    %32 = arith.index_cast %31 : i32 to index
    %33 = memref.load %arg1[%32] : memref<16xi32, #tpu.memory_space<smem>>
    %c0_i32_20 = arith.constant 0 : i32
    %c63_i32_21 = arith.constant 63 : i32
    %34 = arith.maxsi %c0_i32_20, %33 : i32
    %35 = arith.minsi %c63_i32_21, %34 : i32
    %c3_i32_22 = arith.constant 3 : i32
    %c0_i32_23 = arith.constant 0 : i32
    %36 = tpu.memref_slice %arg2[%35, %c0_i32_23] : memref<64x128xf32, #tpu.memory_space<any>> -> memref<1x128xf32, #tpu.memory_space<any>>
    %c3_i32_24 = arith.constant 3 : i32
    %c0_i32_25 = arith.constant 0 : i32
    %37 = tpu.memref_slice %arg3[%c3_i32_24, %c0_i32_25] : memref<8x128xf32, #tpu.memory_space<vmem>> -> memref<1x128xf32, #tpu.memory_space<vmem>>
    %38 = tpu.memref_slice %arg4[%c3_i32_22] : memref<8x!tpu.dma_semaphore, #tpu.memory_space<semaphore_mem>> -> memref<1x!tpu.dma_semaphore, #tpu.memory_space<semaphore_mem>>
    %39 = tpu.memref_squeeze %38 : memref<1x!tpu.dma_semaphore, #tpu.memory_space<semaphore_mem>> -> memref<!tpu.dma_semaphore, #tpu.memory_space<semaphore_mem>>
    tpu.enqueue_dma source(%36 : memref<1x128xf32, #tpu.memory_space<any>>) target(%37 : memref<1x128xf32, #tpu.memory_space<vmem>>) target_semaphore(%39 : memref<!tpu.dma_semaphore, #tpu.memory_space<semaphore_mem>>)
    %c8_i32_26 = arith.constant 8 : i32
    %40 = arith.muli %arg0, %c8_i32_26 : i32
    %c4_i32 = arith.constant 4 : i32
    %41 = arith.addi %40, %c4_i32 : i32
    %42 = arith.index_cast %41 : i32 to index
    %43 = memref.load %arg1[%42] : memref<16xi32, #tpu.memory_space<smem>>
    %c0_i32_27 = arith.constant 0 : i32
    %c63_i32_28 = arith.constant 63 : i32
    %44 = arith.maxsi %c0_i32_27, %43 : i32
    %45 = arith.minsi %c63_i32_28, %44 : i32
    %c4_i32_29 = arith.constant 4 : i32
    %c0_i32_30 = arith.constant 0 : i32
    %46 = tpu.memref_slice %arg2[%45, %c0_i32_30] : memref<64x128xf32, #tpu.memory_space<any>> -> memref<1x128xf32, #tpu.memory_space<any>>
    %c4_i32_31 = arith.constant 4 : i32
    %c0_i32_32 = arith.constant 0 : i32
    %47 = tpu.memref_slice %arg3[%c4_i32_31, %c0_i32_32] : memref<8x128xf32, #tpu.memory_space<vmem>> -> memref<1x128xf32, #tpu.memory_space<vmem>>
    %48 = tpu.memref_slice %arg4[%c4_i32_29] : memref<8x!tpu.dma_semaphore, #tpu.memory_space<semaphore_mem>> -> memref<1x!tpu.dma_semaphore, #tpu.memory_space<semaphore_mem>>
    %49 = tpu.memref_squeeze %48 : memref<1x!tpu.dma_semaphore, #tpu.memory_space<semaphore_mem>> -> memref<!tpu.dma_semaphore, #tpu.memory_space<semaphore_mem>>
    tpu.enqueue_dma source(%46 : memref<1x128xf32, #tpu.memory_space<any>>) target(%47 : memref<1x128xf32, #tpu.memory_space<vmem>>) target_semaphore(%49 : memref<!tpu.dma_semaphore, #tpu.memory_space<semaphore_mem>>)
    %c8_i32_33 = arith.constant 8 : i32
    %50 = arith.muli %arg0, %c8_i32_33 : i32
    %c5_i32 = arith.constant 5 : i32
    %51 = arith.addi %50, %c5_i32 : i32
    %52 = arith.index_cast %51 : i32 to index
    %53 = memref.load %arg1[%52] : memref<16xi32, #tpu.memory_space<smem>>
    %c0_i32_34 = arith.constant 0 : i32
    %c63_i32_35 = arith.constant 63 : i32
    %54 = arith.maxsi %c0_i32_34, %53 : i32
    %55 = arith.minsi %c63_i32_35, %54 : i32
    %c5_i32_36 = arith.constant 5 : i32
    %c0_i32_37 = arith.constant 0 : i32
    %56 = tpu.memref_slice %arg2[%55, %c0_i32_37] : memref<64x128xf32, #tpu.memory_space<any>> -> memref<1x128xf32, #tpu.memory_space<any>>
    %c5_i32_38 = arith.constant 5 : i32
    %c0_i32_39 = arith.constant 0 : i32
    %57 = tpu.memref_slice %arg3[%c5_i32_38, %c0_i32_39] : memref<8x128xf32, #tpu.memory_space<vmem>> -> memref<1x128xf32, #tpu.memory_space<vmem>>
    %58 = tpu.memref_slice %arg4[%c5_i32_36] : memref<8x!tpu.dma_semaphore, #tpu.memory_space<semaphore_mem>> -> memref<1x!tpu.dma_semaphore, #tpu.memory_space<semaphore_mem>>
    %59 = tpu.memref_squeeze %58 : memref<1x!tpu.dma_semaphore, #tpu.memory_space<semaphore_mem>> -> memref<!tpu.dma_semaphore, #tpu.memory_space<semaphore_mem>>
    tpu.enqueue_dma source(%56 : memref<1x128xf32, #tpu.memory_space<any>>) target(%57 : memref<1x128xf32, #tpu.memory_space<vmem>>) target_semaphore(%59 : memref<!tpu.dma_semaphore, #tpu.memory_space<semaphore_mem>>)
    %c8_i32_40 = arith.constant 8 : i32
    %60 = arith.muli %arg0, %c8_i32_40 : i32
    %c6_i32 = arith.constant 6 : i32
    %61 = arith.addi %60, %c6_i32 : i32
    %62 = arith.index_cast %61 : i32 to index
    %63 = memref.load %arg1[%62] : memref<16xi32, #tpu.memory_space<smem>>
    %c0_i32_41 = arith.constant 0 : i32
    %c63_i32_42 = arith.constant 63 : i32
    %64 = arith.maxsi %c0_i32_41, %63 : i32
    %65 = arith.minsi %c63_i32_42, %64 : i32
    %c6_i32_43 = arith.constant 6 : i32
    %c0_i32_44 = arith.constant 0 : i32
    %66 = tpu.memref_slice %arg2[%65, %c0_i32_44] : memref<64x128xf32, #tpu.memory_space<any>> -> memref<1x128xf32, #tpu.memory_space<any>>
    %c6_i32_45 = arith.constant 6 : i32
    %c0_i32_46 = arith.constant 0 : i32
    %67 = tpu.memref_slice %arg3[%c6_i32_45, %c0_i32_46] : memref<8x128xf32, #tpu.memory_space<vmem>> -> memref<1x128xf32, #tpu.memory_space<vmem>>
    %68 = tpu.memref_slice %arg4[%c6_i32_43] : memref<8x!tpu.dma_semaphore, #tpu.memory_space<semaphore_mem>> -> memref<1x!tpu.dma_semaphore, #tpu.memory_space<semaphore_mem>>
    %69 = tpu.memref_squeeze %68 : memref<1x!tpu.dma_semaphore, #tpu.memory_space<semaphore_mem>> -> memref<!tpu.dma_semaphore, #tpu.memory_space<semaphore_mem>>
    tpu.enqueue_dma source(%66 : memref<1x128xf32, #tpu.memory_space<any>>) target(%67 : memref<1x128xf32, #tpu.memory_space<vmem>>) target_semaphore(%69 : memref<!tpu.dma_semaphore, #tpu.memory_space<semaphore_mem>>)
    %c8_i32_47 = arith.constant 8 : i32
    %70 = arith.muli %arg0, %c8_i32_47 : i32
    %c7_i32 = arith.constant 7 : i32
    %71 = arith.addi %70, %c7_i32 : i32
    %72 = arith.index_cast %71 : i32 to index
    %73 = memref.load %arg1[%72] : memref<16xi32, #tpu.memory_space<smem>>
    %c0_i32_48 = arith.constant 0 : i32
    %c63_i32_49 = arith.constant 63 : i32
    %74 = arith.maxsi %c0_i32_48, %73 : i32
    %75 = arith.minsi %c63_i32_49, %74 : i32
    %c7_i32_50 = arith.constant 7 : i32
    %c0_i32_51 = arith.constant 0 : i32
    %76 = tpu.memref_slice %arg2[%75, %c0_i32_51] : memref<64x128xf32, #tpu.memory_space<any>> -> memref<1x128xf32, #tpu.memory_space<any>>
    %c7_i32_52 = arith.constant 7 : i32
    %c0_i32_53 = arith.constant 0 : i32
    %77 = tpu.memref_slice %arg3[%c7_i32_52, %c0_i32_53] : memref<8x128xf32, #tpu.memory_space<vmem>> -> memref<1x128xf32, #tpu.memory_space<vmem>>
    %78 = tpu.memref_slice %arg4[%c7_i32_50] : memref<8x!tpu.dma_semaphore, #tpu.memory_space<semaphore_mem>> -> memref<1x!tpu.dma_semaphore, #tpu.memory_space<semaphore_mem>>
    %79 = tpu.memref_squeeze %78 : memref<1x!tpu.dma_semaphore, #tpu.memory_space<semaphore_mem>> -> memref<!tpu.dma_semaphore, #tpu.memory_space<semaphore_mem>>
    tpu.enqueue_dma source(%76 : memref<1x128xf32, #tpu.memory_space<any>>) target(%77 : memref<1x128xf32, #tpu.memory_space<vmem>>) target_semaphore(%79 : memref<!tpu.dma_semaphore, #tpu.memory_space<semaphore_mem>>)
    %c0_i32_54 = arith.constant 0 : i32
    %c0_i32_55 = arith.constant 0 : i32
    %80 = tpu.memref_slice %arg2[%5, %c0_i32_55] : memref<64x128xf32, #tpu.memory_space<any>> -> memref<1x128xf32, #tpu.memory_space<any>>
    %c0_i32_56 = arith.constant 0 : i32
    %c0_i32_57 = arith.constant 0 : i32
    %81 = tpu.memref_slice %arg3[%c0_i32_56, %c0_i32_57] : memref<8x128xf32, #tpu.memory_space<vmem>> -> memref<1x128xf32, #tpu.memory_space<vmem>>
    %82 = tpu.memref_slice %arg4[%c0_i32_54] : memref<8x!tpu.dma_semaphore, #tpu.memory_space<semaphore_mem>> -> memref<1x!tpu.dma_semaphore, #tpu.memory_space<semaphore_mem>>
    %83 = tpu.memref_squeeze %82 : memref<1x!tpu.dma_semaphore, #tpu.memory_space<semaphore_mem>> -> memref<!tpu.dma_semaphore, #tpu.memory_space<semaphore_mem>>
    tpu.wait_dma2 semaphore(%83 : memref<!tpu.dma_semaphore, #tpu.memory_space<semaphore_mem>>) src(%80 : memref<1x128xf32, #tpu.memory_space<any>>) dst(%81 : memref<1x128xf32, #tpu.memory_space<vmem>>)
    %c1_i32_58 = arith.constant 1 : i32
    %c0_i32_59 = arith.constant 0 : i32
    %84 = tpu.memref_slice %arg2[%15, %c0_i32_59] : memref<64x128xf32, #tpu.memory_space<any>> -> memref<1x128xf32, #tpu.memory_space<any>>
    %c1_i32_60 = arith.constant 1 : i32
    %c0_i32_61 = arith.constant 0 : i32
    %85 = tpu.memref_slice %arg3[%c1_i32_60, %c0_i32_61] : memref<8x128xf32, #tpu.memory_space<vmem>> -> memref<1x128xf32, #tpu.memory_space<vmem>>
    %86 = tpu.memref_slice %arg4[%c1_i32_58] : memref<8x!tpu.dma_semaphore, #tpu.memory_space<semaphore_mem>> -> memref<1x!tpu.dma_semaphore, #tpu.memory_space<semaphore_mem>>
    %87 = tpu.memref_squeeze %86 : memref<1x!tpu.dma_semaphore, #tpu.memory_space<semaphore_mem>> -> memref<!tpu.dma_semaphore, #tpu.memory_space<semaphore_mem>>
    tpu.wait_dma2 semaphore(%87 : memref<!tpu.dma_semaphore, #tpu.memory_space<semaphore_mem>>) src(%84 : memref<1x128xf32, #tpu.memory_space<any>>) dst(%85 : memref<1x128xf32, #tpu.memory_space<vmem>>)
    %c2_i32_62 = arith.constant 2 : i32
    %c0_i32_63 = arith.constant 0 : i32
    %88 = tpu.memref_slice %arg2[%25, %c0_i32_63] : memref<64x128xf32, #tpu.memory_space<any>> -> memref<1x128xf32, #tpu.memory_space<any>>
    %c2_i32_64 = arith.constant 2 : i32
    %c0_i32_65 = arith.constant 0 : i32
    %89 = tpu.memref_slice %arg3[%c2_i32_64, %c0_i32_65] : memref<8x128xf32, #tpu.memory_space<vmem>> -> memref<1x128xf32, #tpu.memory_space<vmem>>
    %90 = tpu.memref_slice %arg4[%c2_i32_62] : memref<8x!tpu.dma_semaphore, #tpu.memory_space<semaphore_mem>> -> memref<1x!tpu.dma_semaphore, #tpu.memory_space<semaphore_mem>>
    %91 = tpu.memref_squeeze %90 : memref<1x!tpu.dma_semaphore, #tpu.memory_space<semaphore_mem>> -> memref<!tpu.dma_semaphore, #tpu.memory_space<semaphore_mem>>
    tpu.wait_dma2 semaphore(%91 : memref<!tpu.dma_semaphore, #tpu.memory_space<semaphore_mem>>) src(%88 : memref<1x128xf32, #tpu.memory_space<any>>) dst(%89 : memref<1x128xf32, #tpu.memory_space<vmem>>)
    %c3_i32_66 = arith.constant 3 : i32
    %c0_i32_67 = arith.constant 0 : i32
    %92 = tpu.memref_slice %arg2[%35, %c0_i32_67] : memref<64x128xf32, #tpu.memory_space<any>> -> memref<1x128xf32, #tpu.memory_space<any>>
    %c3_i32_68 = arith.constant 3 : i32
    %c0_i32_69 = arith.constant 0 : i32
    %93 = tpu.memref_slice %arg3[%c3_i32_68, %c0_i32_69] : memref<8x128xf32, #tpu.memory_space<vmem>> -> memref<1x128xf32, #tpu.memory_space<vmem>>
    %94 = tpu.memref_slice %arg4[%c3_i32_66] : memref<8x!tpu.dma_semaphore, #tpu.memory_space<semaphore_mem>> -> memref<1x!tpu.dma_semaphore, #tpu.memory_space<semaphore_mem>>
    %95 = tpu.memref_squeeze %94 : memref<1x!tpu.dma_semaphore, #tpu.memory_space<semaphore_mem>> -> memref<!tpu.dma_semaphore, #tpu.memory_space<semaphore_mem>>
    tpu.wait_dma2 semaphore(%95 : memref<!tpu.dma_semaphore, #tpu.memory_space<semaphore_mem>>) src(%92 : memref<1x128xf32, #tpu.memory_space<any>>) dst(%93 : memref<1x128xf32, #tpu.memory_space<vmem>>)
    %c4_i32_70 = arith.constant 4 : i32
    %c0_i32_71 = arith.constant 0 : i32
    %96 = tpu.memref_slice %arg2[%45, %c0_i32_71] : memref<64x128xf32, #tpu.memory_space<any>> -> memref<1x128xf32, #tpu.memory_space<any>>
    %c4_i32_72 = arith.constant 4 : i32
    %c0_i32_73 = arith.constant 0 : i32
    %97 = tpu.memref_slice %arg3[%c4_i32_72, %c0_i32_73] : memref<8x128xf32, #tpu.memory_space<vmem>> -> memref<1x128xf32, #tpu.memory_space<vmem>>
    %98 = tpu.memref_slice %arg4[%c4_i32_70] : memref<8x!tpu.dma_semaphore, #tpu.memory_space<semaphore_mem>> -> memref<1x!tpu.dma_semaphore, #tpu.memory_space<semaphore_mem>>
    %99 = tpu.memref_squeeze %98 : memref<1x!tpu.dma_semaphore, #tpu.memory_space<semaphore_mem>> -> memref<!tpu.dma_semaphore, #tpu.memory_space<semaphore_mem>>
    tpu.wait_dma2 semaphore(%99 : memref<!tpu.dma_semaphore, #tpu.memory_space<semaphore_mem>>) src(%96 : memref<1x128xf32, #tpu.memory_space<any>>) dst(%97 : memref<1x128xf32, #tpu.memory_space<vmem>>)
    %c5_i32_74 = arith.constant 5 : i32
    %c0_i32_75 = arith.constant 0 : i32
    %100 = tpu.memref_slice %arg2[%55, %c0_i32_75] : memref<64x128xf32, #tpu.memory_space<any>> -> memref<1x128xf32, #tpu.memory_space<any>>
    %c5_i32_76 = arith.constant 5 : i32
    %c0_i32_77 = arith.constant 0 : i32
    %101 = tpu.memref_slice %arg3[%c5_i32_76, %c0_i32_77] : memref<8x128xf32, #tpu.memory_space<vmem>> -> memref<1x128xf32, #tpu.memory_space<vmem>>
    %102 = tpu.memref_slice %arg4[%c5_i32_74] : memref<8x!tpu.dma_semaphore, #tpu.memory_space<semaphore_mem>> -> memref<1x!tpu.dma_semaphore, #tpu.memory_space<semaphore_mem>>
    %103 = tpu.memref_squeeze %102 : memref<1x!tpu.dma_semaphore, #tpu.memory_space<semaphore_mem>> -> memref<!tpu.dma_semaphore, #tpu.memory_space<semaphore_mem>>
    tpu.wait_dma2 semaphore(%103 : memref<!tpu.dma_semaphore, #tpu.memory_space<semaphore_mem>>) src(%100 : memref<1x128xf32, #tpu.memory_space<any>>) dst(%101 : memref<1x128xf32, #tpu.memory_space<vmem>>)
    %c6_i32_78 = arith.constant 6 : i32
    %c0_i32_79 = arith.constant 0 : i32
    %104 = tpu.memref_slice %arg2[%65, %c0_i32_79] : memref<64x128xf32, #tpu.memory_space<any>> -> memref<1x128xf32, #tpu.memory_space<any>>
    %c6_i32_80 = arith.constant 6 : i32
    %c0_i32_81 = arith.constant 0 : i32
    %105 = tpu.memref_slice %arg3[%c6_i32_80, %c0_i32_81] : memref<8x128xf32, #tpu.memory_space<vmem>> -> memref<1x128xf32, #tpu.memory_space<vmem>>
    %106 = tpu.memref_slice %arg4[%c6_i32_78] : memref<8x!tpu.dma_semaphore, #tpu.memory_space<semaphore_mem>> -> memref<1x!tpu.dma_semaphore, #tpu.memory_space<semaphore_mem>>
    %107 = tpu.memref_squeeze %106 : memref<1x!tpu.dma_semaphore, #tpu.memory_space<semaphore_mem>> -> memref<!tpu.dma_semaphore, #tpu.memory_space<semaphore_mem>>
    tpu.wait_dma2 semaphore(%107 : memref<!tpu.dma_semaphore, #tpu.memory_space<semaphore_mem>>) src(%104 : memref<1x128xf32, #tpu.memory_space<any>>) dst(%105 : memref<1x128xf32, #tpu.memory_space<vmem>>)
    %c7_i32_82 = arith.constant 7 : i32
    %c0_i32_83 = arith.constant 0 : i32
    %108 = tpu.memref_slice %arg2[%75, %c0_i32_83] : memref<64x128xf32, #tpu.memory_space<any>> -> memref<1x128xf32, #tpu.memory_space<any>>
    %c7_i32_84 = arith.constant 7 : i32
    %c0_i32_85 = arith.constant 0 : i32
    %109 = tpu.memref_slice %arg3[%c7_i32_84, %c0_i32_85] : memref<8x128xf32, #tpu.memory_space<vmem>> -> memref<1x128xf32, #tpu.memory_space<vmem>>
    %110 = tpu.memref_slice %arg4[%c7_i32_82] : memref<8x!tpu.dma_semaphore, #tpu.memory_space<semaphore_mem>> -> memref<1x!tpu.dma_semaphore, #tpu.memory_space<semaphore_mem>>
    %111 = tpu.memref_squeeze %110 : memref<1x!tpu.dma_semaphore, #tpu.memory_space<semaphore_mem>> -> memref<!tpu.dma_semaphore, #tpu.memory_space<semaphore_mem>>
    tpu.wait_dma2 semaphore(%111 : memref<!tpu.dma_semaphore, #tpu.memory_space<semaphore_mem>>) src(%108 : memref<1x128xf32, #tpu.memory_space<any>>) dst(%109 : memref<1x128xf32, #tpu.memory_space<vmem>>)
    return
  }
  func.func @transform_1(%arg0: i32, %arg1: memref<16xi32, #tpu.memory_space<smem>>) -> (i32, i32) {
    %c0_i32 = arith.constant 0 : i32
    %c0_i32_0 = arith.constant 0 : i32
    return %arg0, %c0_i32 : i32, i32
  }
}

</mosaic_0001>

<bundles_post_ra>
// kernel: tpu_custom_call.1
= control target key start
LH: loop header
LB: loop body
LE: loop exit
PB: predicated region body
PF: predicated region fallthrough
CT: control target
= control target key end

     0   :  { %s819_s9 = smov [#allocation4]   ;;  %s1225_s0 = inlined_call_operand.hbm [shape: s32[16], index: 0, kind: input, shape index: {}]   ;;  %s1226_s1 = inlined_call_operand.hbm [shape: f32[64,128], index: 1, kind: input, shape index: {}]   ;;  %s1227_s2 = inlined_call_operand.hbm [shape: f32[16,128], index: 2, kind: output, shape index: {}]  }
   0x1   :  { %8 = dma.hbm_to_smem %s1225_s0, 16, %s819_s9, [#allocation3] }
   0x2   :  { %769 = dma.done.wait [#allocation3], 16 }
   0x3   :  { %770 = vsyncadd [#allocation3], 4294967280 }
   0x4   :  { %10 = sfence }
   0x5   :  { %11 = vsyncpa [#allocation6], 0 }
   0x6   :  { %13 = vsyncpa [#allocation6 + $0x1], 0  ;;  %s839_s12 = smov 0   ;;  %s841_s13 = smov 0  }
   0x7   :  { %s843_s14 = smov 0  }
   0x8 LB: > { %s363_s0 = sadd.s32 4294967295, %s817_s14   ;;  %s856_s15 = sadd.s32 1, %s817_s14   ;;  %s817_s14 = sphi %s843_s14, %s1242_s14   ;;  %s813_s13 = sphi %s841_s13, %s1241_s13   ;;  %s809_s12 = sphi %s839_s12, %s1240_s12  }
   0x9   : > { %s22_s16 = ssub.s32 %s817_s14, %s856_s15  ;;  %s25_s17 = sadd.s32 1, %s813_s13 }
   0xa   : > { %p23_p0 = scmp.eq.s32.totalorder %s22_s16, 0  ;;  %p364_p1 = scmp.ne.s32.totalorder %s22_s16, 0 }
   0xb   : > { %p29_p2 = scmp.eq.s32.totalorder %s817_s14, 1  ;;  %p34_p3 = scmp.ne.s32.totalorder %s813_s13, %s809_s12 }
   0xc   : > { %s865_s18 = scalar_select %p23_p0, %s813_s13, %s25_s17  }
   0xd   : > { %p867_p4 = por %p364_p1, %p29_p2  ;;  %p35_p5 = scmp.eq.s32.totalorder %s363_s0, 1 }
   0xe   : > { %p486_p6 = scmp.lt.s32.totalorder %s817_s14, 2  ;;  %s49_s21 = sand.u32 1, %s813_s13  }
   0xf   : > { %p872_p7 = por %p35_p5, %p34_p3  ;;  %s366_s22 = sshll.u32 %s49_s21, 3 }
  0x10   : > { %s880_s23 = sshll.u32 %s817_s14, 3  ;;  %s887_s26 = scalar_lea.vmem [#allocation5], %s366_s22 }
  0x11   : > { %s1230_s20 = scalar_select %p872_p7, 1, 0 }
  0x12   : > { %s447_s24 = scalar_select %p486_p6, [#allocation4], [#allocation25] }
  0x13   : > { %s448_s25 = scalar_select %p486_p6, %s880_s23, 0 }
  0x14   : > { %s67_s27 = sshll.u32 %s887_s26, 4  ;;  %s71_s28 = sadd.s32 1, %s880_s23  ;;  %s896_s27 = int_to_ptr.vmem [resolvable:$true] %s67_s27 }
  0x15   : > { %s53_s29 = sld [smem:[%s447_s24 + %s448_s25]]  ;;  %s79_s30 = scalar_lea.vmem %s887_s26, 1 [#allocation5] }
  0x16   : > { %s450_s3 = scalar_select %p486_p6, [#allocation4], [#allocation26] }
  0x17   : > { %s1244_s28 = smov (!%p486_p6, %s71_s28), 0  ;;  %s88_s4 = sshll.u32 %s79_s30, 4  ;;  %s909_s4 = int_to_ptr.vmem [resolvable:$true] %s88_s4 }
  0x18   : > { %s898_s5 = sld [smem:[%s450_s3 + %s1244_s28]]  ;;  %s92_s6 = sadd.s32 2, %s880_s23 }
  0x19   : > { %s453_s7 = scalar_select %p486_p6, [#allocation4], [#allocation27] }
  0x1a   : > { %s1246_s6 = smov (!%p486_p6, %s92_s6), 0  ;;  %s100_s9 = scalar_lea.vmem %s887_s26, 2 [#allocation5] }
  0x1b   : > { %p54_p8 = scmp.gt.s32.totalorder %s53_s29, 0  ;;  %p368_p9 = scmp.lt.s32.totalorder %s53_s29, 63 }
  0x1c   : > { %s905_s8 = sld [smem:[%s453_s7 + %s1246_s6]]  ;;  %s915_s17 = sshll.u32 %s100_s9, 4  ;;  %s958_s17 = int_to_ptr.vmem [resolvable:$true] %s915_s17 }
  0x1d   : > { %s1248_s29 = smov (!%p54_p8, %s53_s29), 0  ;;  %s922_s28 = scalar_lea.hbm %s1226_s1, 1024 }
  0x1e   : > { %s1250_s29 = smov (!%p368_p9, %s1248_s29), 63  ;;  %p73_p10 = scmp.gt.s32.totalorder %s898_s5, 0 }
  0x1f   : > { %s373_s10 = sshll.u32 %s1250_s29, 4  ;;  %p374_p11 = scmp.lt.s32.totalorder %s898_s5, 63 }
  0x20   : > { %s59_s16 = scalar_lea.hbm %s1226_s1, %s373_s10 }
  0x21   : > { %s521_s22 = scalar_lea.hbm %s59_s16, 16  ;;  %p526_p1 = scmp.lt.s32.totalorder %s59_s16, %s1226_s1 }
  0x22   : > { %p522_p12 = scmp.ne.s32.totalorder %s59_s16, %s521_s22  ;;  %p527_p2 = scmp.lt.s32.totalorder %s922_s28, %s521_s22 }
  0x24   : > { %p523_p13 = pnand %p522_p12, %p486_p6  ;;  %p528_p3 = por %p527_p2, %p526_p1 }
  0x26   : > { %p524_p0 = pneg %p523_p13 }
  0x28   : > { %p529_p5 = pnand %p528_p3, %p524_p0 }
  0x2a   : > { %532 = shalt.err (!%p529_p5)  }
  0x2b   : > { %s533_s29 = scalar_lea.vmem %s896_s27, 16  ;;  %s820_s6 = smov [#allocation5]  }
  0x2c   : > { %p534_p8 = scmp.ne.s32.totalorder %s896_s27, %s533_s29  ;;  %s537_s7 = sshll.u32 %s820_s6, 4  ;;  %s932_s7 = int_to_ptr.vmem [resolvable:$false] %s537_s7 }
  0x2d   : > { %s935_s9 = scalar_lea.vmem %s932_s7, 256  ;;  %p1228_p13 = scmp.lt.s32.totalorder %s896_s27, %s932_s7 }
  0x2e   : > { %p535_p9 = pnand %p534_p8, %p486_p6  ;;  %p541_p0 = scmp.lt.s32.totalorder %s935_s9, %s533_s29 }
  0x30   : > { %p536_p12 = pneg %p535_p9  ;;  %p542_p1 = por %p541_p0, %p1228_p13 }
  0x32   : > { %p543_p2 = pnand %p542_p1, %p536_p12 }
  0x34   : > { %546 = shalt.err (!%p543_p2)  }
  0x35   : > { %449 = dma.hbm_to_vmem [thread:$0]  (%p486_p6), %s59_s16, 16, %s896_s27, [#allocation2] }
  0x36   : > { %s74_s10 = scalar_select %p73_p10, %s898_s5, 0 }
  0x37   : > { %p94_p3 = scmp.gt.s32.totalorder %s905_s8, 0 }
  0x38   : > { %s1252_s10 = smov (!%p374_p11, %s74_s10), 63 }
  0x39   : > { %s95_s11 = scalar_select %p94_p3, %s905_s8, 0 }
  0x3a   : > { %s379_s0 = sshll.u32 %s1252_s10, 4 }
  0x3b   : > { %s78_s25 = scalar_lea.hbm %s1226_s1, %s379_s0 }
  0x3c   : > { %s547_s30 = scalar_lea.hbm %s78_s25, 16  ;;  %p552_p10 = scmp.lt.s32.totalorder %s78_s25, %s1226_s1 }
  0x3d   : > { %p548_p8 = scmp.ne.s32.totalorder %s78_s25, %s547_s30  ;;  %p553_p0 = scmp.lt.s32.totalorder %s922_s28, %s547_s30 }
  0x3f   : > { %p549_p9 = pnand %p548_p8, %p486_p6  ;;  %p554_p1 = por %p553_p0, %p552_p10 }
  0x41   : > { %p550_p12 = pneg %p549_p9 }
  0x43   : > { %p555_p11 = pnand %p554_p1, %p550_p12 }
  0x45   : > { %558 = shalt.err (!%p555_p11)  }
  0x46   : > { %s559_s5 = scalar_lea.vmem %s909_s4, 16  ;;  %p566_p9 = scmp.lt.s32.totalorder %s909_s4, %s932_s7 }
  0x47   : > { %p560_p2 = scmp.ne.s32.totalorder %s909_s4, %s559_s5  ;;  %p567_p13 = scmp.lt.s32.totalorder %s935_s9, %s559_s5 }
  0x49   : > { %p561_p3 = pnand %p560_p2, %p486_p6  ;;  %p568_p5 = por %p567_p13, %p566_p9 }
  0x4b   : > { %p562_p8 = pneg %p561_p3 }
  0x4d   : > { %p569_p7 = pnand %p568_p5, %p562_p8 }
  0x4f   : > { %572 = shalt.err (!%p569_p7)  }
  0x50   : > { %452 = dma.hbm_to_vmem [thread:$0]  (%p486_p6), %s78_s25, 16, %s909_s4, [#allocation2 + $0x1] }
  0x51   : > { %p1231_p12 = scmp.lt.s32.totalorder %s905_s8, 63  ;;  %s113_s10 = sadd.s32 3, %s880_s23 }
  0x52   : > { %s456_s29 = scalar_select %p486_p6, [#allocation4], [#allocation28] }
  0x53   : > { %s1254_s11 = smov (!%p1231_p12, %s95_s11), 63  ;;  %s121_s30 = scalar_lea.vmem %s887_s26, 3 [#allocation5] }
  0x54   : > { %s385_s6 = sshll.u32 %s1254_s11, 4 }
  0x55   : > { %s99_s24 = scalar_lea.hbm %s1226_s1, %s385_s6 }
  0x56   : > { %s573_s16 = scalar_lea.hbm %s99_s24, 16  ;;  %p578_p10 = scmp.lt.s32.totalorder %s99_s24, %s1226_s1 }
  0x57   : > { %p574_p7 = scmp.ne.s32.totalorder %s99_s24, %s573_s16  ;;  %p579_p0 = scmp.lt.s32.totalorder %s922_s28, %s573_s16 }
  0x59   : > { %p575_p13 = pnand %p574_p7, %p486_p6  ;;  %p580_p1 = por %p579_p0, %p578_p10 }
  0x5b   : > { %p576_p5 = pneg %p575_p13 }
  0x5d   : > { %p581_p11 = pnand %p580_p1, %p576_p5 }
  0x5f   : > { %584 = shalt.err (!%p581_p11)  }
  0x60   : > { %s585_s4 = scalar_lea.vmem %s958_s17, 16  ;;  %p592_p9 = scmp.lt.s32.totalorder %s958_s17, %s932_s7 }
  0x61   : > { %p586_p2 = scmp.ne.s32.totalorder %s958_s17, %s585_s4  ;;  %p593_p12 = scmp.lt.s32.totalorder %s935_s9, %s585_s4 }
  0x63   : > { %p587_p3 = pnand %p586_p2, %p486_p6  ;;  %p594_p7 = por %p593_p12, %p592_p9 }
  0x65   : > { %p588_p8 = pneg %p587_p3 }
  0x67   : > { %p595_p13 = pnand %p594_p7, %p588_p8 }
  0x69   : > { %598 = shalt.err (!%p595_p13)  }
  0x6a   : > { %455 = dma.hbm_to_vmem [thread:$0]  (%p486_p6), %s99_s24, 16, %s958_s17, [#allocation2 + $0x2] }
  0x6b   : > { %s1256_s10 = smov (!%p486_p6, %s113_s10), 0  ;;  %s130_s8 = sshll.u32 %s121_s30, 4  ;;  %s1009_s8 = int_to_ptr.vmem [resolvable:$true] %s130_s8 }
  0x6c   : > { %s134_s11 = sadd.s32 4, %s880_s23  ;;  %s114_s25 = sld [smem:[%s456_s29 + %s1256_s10]] }
  0x6d   : > { %s142_s6 = scalar_lea.vmem %s887_s26, 4 [#allocation5]  ;;  %s1258_s11 = smov (!%p486_p6, %s134_s11), 0 }
  0x6e   : > { %s459_s0 = scalar_select %p486_p6, [#allocation4], [#allocation29] }
  0x6f   : > { %s151_s22 = sshll.u32 %s142_s6, 4  ;;  %s155_s3 = sadd.s32 5, %s880_s23  ;;  %s1022_s22 = int_to_ptr.vmem [resolvable:$true] %s151_s22 }
  0x70   : > { %s1011_s16 = sld [smem:[%s459_s0 + %s1258_s11]]  ;;  %s1260_s3 = smov (!%p486_p6, %s155_s3), 0 }
  0x71   : > { %s462_s17 = scalar_select %p486_p6, [#allocation4], [#allocation30] }
  0x72   : > { %p115_p5 = scmp.gt.s32.totalorder %s114_s25, 0  ;;  %p386_p10 = scmp.lt.s32.totalorder %s114_s25, 63 }
  0x73   : > { %s1018_s29 = sld [smem:[%s462_s17 + %s1260_s3]]  ;;  %s163_s10 = scalar_lea.vmem %s887_s26, 5 [#allocation5] }
  0x74   : > { %s1262_s25 = smov (!%p115_p5, %s114_s25), 0  ;;  %s1024_s30 = sshll.u32 %s163_s10, 4  ;;  %s1058_s30 = int_to_ptr.vmem [resolvable:$true] %s1024_s30 }
  0x75   : > { %s1264_s25 = smov (!%p386_p10, %s1262_s25), 63 }
  0x76   : > { %s391_s24 = sshll.u32 %s1264_s25, 4 }
  0x77   : > { %s120_s11 = scalar_lea.hbm %s1226_s1, %s391_s24 }
  0x78   : > { %s599_s6 = scalar_lea.hbm %s120_s11, 16  ;;  %p604_p8 = scmp.lt.s32.totalorder %s120_s11, %s1226_s1 }
  0x79   : > { %p600_p11 = scmp.ne.s32.totalorder %s120_s11, %s599_s6  ;;  %p605_p9 = scmp.lt.s32.totalorder %s922_s28, %s599_s6 }
  0x7b   : > { %p601_p2 = pnand %p600_p11, %p486_p6  ;;  %p606_p12 = por %p605_p9, %p604_p8 }
  0x7d   : > { %p602_p3 = pneg %p601_p2 }
  0x7f   : > { %p607_p7 = pnand %p606_p12, %p602_p3 }
  0x81   : > { %610 = shalt.err (!%p607_p7)  }
  0x82   : > { %s611_s25 = scalar_lea.vmem %s1009_s8, 16  ;;  %p618_p11 = scmp.lt.s32.totalorder %s1009_s8, %s932_s7 }
  0x83   : > { %p612_p13 = scmp.ne.s32.totalorder %s1009_s8, %s611_s25  ;;  %p619_p2 = scmp.lt.s32.totalorder %s935_s9, %s611_s25 }
  0x85   : > { %p613_p5 = pnand %p612_p13, %p486_p6  ;;  %p620_p1 = por %p619_p2, %p618_p11 }
  0x87   : > { %p614_p10 = pneg %p613_p5 }
  0x89   : > { %p621_p0 = pnand %p620_p1, %p614_p10 }
  0x8b   : > { %624 = shalt.err (!%p621_p0)  }
  0x8c   : > { %458 = dma.hbm_to_vmem [thread:$0]  (%p486_p6), %s120_s11, 16, %s1009_s8, [#allocation2 + $0x3] }
  0x8d   : > { %p1232_p3 = scmp.gt.s32.totalorder %s1011_s16, 0  ;;  %p157_p8 = scmp.gt.s32.totalorder %s1018_s29, 0 }
  0x8e   : > { %p1233_p12 = scmp.lt.s32.totalorder %s1011_s16, 63 }
  0x8f   : > { %s137_s17 = scalar_select %p1232_p3, %s1011_s16, 0 }
  0x90   : > { %s158_s10 = scalar_select %p157_p8, %s1018_s29, 0 }
  0x91   : > { %s1266_s17 = smov (!%p1233_p12, %s137_s17), 63 }
  0x92   : > { %s397_s24 = sshll.u32 %s1266_s17, 4 }
  0x93   : > { %s141_s6 = scalar_lea.hbm %s1226_s1, %s397_s24 }
  0x94   : > { %s625_s0 = scalar_lea.hbm %s141_s6, 16  ;;  %p630_p13 = scmp.lt.s32.totalorder %s141_s6, %s1226_s1 }
  0x95   : > { %p626_p0 = scmp.ne.s32.totalorder %s141_s6, %s625_s0  ;;  %p631_p5 = scmp.lt.s32.totalorder %s922_s28, %s625_s0 }
  0x97   : > { %p627_p1 = pnand %p626_p0, %p486_p6  ;;  %p632_p10 = por %p631_p5, %p630_p13 }
  0x99   : > { %p628_p7 = pneg %p627_p1 }
  0x9b   : > { %p633_p11 = pnand %p632_p10, %p628_p7 }
  0x9d   : > { %636 = shalt.err (!%p633_p11)  }
  0x9e   : > { %s637_s16 = scalar_lea.vmem %s1022_s22, 16  ;;  %p644_p12 = scmp.lt.s32.totalorder %s1022_s22, %s932_s7 }
  0x9f   : > { %p638_p2 = scmp.ne.s32.totalorder %s1022_s22, %s637_s16  ;;  %p645_p0 = scmp.lt.s32.totalorder %s935_s9, %s637_s16 }
  0xa1   : > { %p639_p3 = pnand %p638_p2, %p486_p6  ;;  %p646_p1 = por %p645_p0, %p644_p12 }
  0xa3   : > { %p640_p8 = pneg %p639_p3 }
  0xa5   : > { %p647_p9 = pnand %p646_p1, %p640_p8 }
  0xa7   : > { %650 = shalt.err (!%p647_p9)  }
  0xa8   : > { %461 = dma.hbm_to_vmem [thread:$0]  (%p486_p6), %s141_s6, 16, %s1022_s22, [#allocation2 + $0x4] }
  0xa9   : > { %p1234_p7 = scmp.lt.s32.totalorder %s1018_s29, 63  ;;  %s176_s17 = sadd.s32 6, %s880_s23 }
  0xaa   : > { %s465_s3 = scalar_select %p486_p6, [#allocation4], [#allocation31] }
  0xab   : > { %s1268_s10 = smov (!%p1234_p7, %s158_s10), 63  ;;  %s197_s0 = sadd.s32 7, %s880_s23 }
  0xac   : > { %s403_s25 = sshll.u32 %s1268_s10, 4 }
  0xad   : > { %s162_s4 = scalar_lea.hbm %s1226_s1, %s403_s25 }
  0xae   : > { %s651_s8 = scalar_lea.hbm %s162_s4, 16  ;;  %p656_p10 = scmp.lt.s32.totalorder %s162_s4, %s1226_s1 }
  0xaf   : > { %p652_p9 = scmp.ne.s32.totalorder %s162_s4, %s651_s8  ;;  %p657_p11 = scmp.lt.s32.totalorder %s922_s28, %s651_s8 }
  0xb1   : > { %p653_p13 = pnand %p652_p9, %p486_p6  ;;  %p658_p2 = por %p657_p11, %p656_p10 }
  0xb3   : > { %p654_p5 = pneg %p653_p13 }
  0xb5   : > { %p659_p3 = pnand %p658_p2, %p654_p5 }
  0xb7   : > { %662 = shalt.err (!%p659_p3)  }
  0xb8   : > { %s663_s23 = scalar_lea.vmem %s1058_s30, 16  ;;  %p670_p1 = scmp.lt.s32.totalorder %s1058_s30, %s932_s7 }
  0xb9   : > { %p664_p8 = scmp.ne.s32.totalorder %s1058_s30, %s663_s23  ;;  %p671_p7 = scmp.lt.s32.totalorder %s935_s9, %s663_s23 }
  0xbb   : > { %p665_p12 = pnand %p664_p8, %p486_p6  ;;  %p672_p9 = por %p671_p7, %p670_p1 }
  0xbd   : > { %p666_p0 = pneg %p665_p12 }
  0xbf   : > { %p673_p13 = pnand %p672_p9, %p666_p0 }
  0xc1   : > { %676 = shalt.err (!%p673_p13)  }
  0xc2   : > { %464 = dma.hbm_to_vmem [thread:$0]  (%p486_p6), %s162_s4, 16, %s1058_s30, [#allocation2 + $0x5] }
  0xc3   : > { %s1270_s17 = smov (!%p486_p6, %s176_s17), 0  ;;  %s184_s10 = scalar_lea.vmem %s887_s26, 6 [#allocation5] }
  0xc4   : > { %s468_s22 = scalar_select %p486_p6, [#allocation4], [#allocation32] }
  0xc5   : > { %s177_s29 = sld [smem:[%s465_s3 + %s1270_s17]]  ;;  %s1272_s0 = smov (!%p486_p6, %s197_s0), 0 }
  0xc6   : > { %s1108_s6 = sld [smem:[%s468_s22 + %s1272_s0]]  ;;  %s193_s25 = sshll.u32 %s184_s10, 4  ;;  %s194_s25 = int_to_ptr.vmem [resolvable:$true] %s193_s25 }
  0xc7   : > { %s205_s30 = scalar_lea.vmem %s887_s26, 7 [#allocation5] }
  0xc8   : > { %s214_s0 = sshll.u32 %s205_s30, 4  ;;  %s215_s0 = int_to_ptr.vmem [resolvable:$true] %s214_s0 }
  0xcb   : > { %p178_p5 = scmp.gt.s32.totalorder %s177_s29, 0  ;;  %p404_p10 = scmp.lt.s32.totalorder %s177_s29, 63 }
  0xcc   : > { %p199_p11 = scmp.gt.s32.totalorder %s1108_s6, 0 }
  0xcd   : > { %s1274_s29 = smov (!%p178_p5, %s177_s29), 0 }
  0xce   : > { %s1276_s29 = smov (!%p404_p10, %s1274_s29), 63 }
  0xcf   : > { %s200_s3 = scalar_select %p199_p11, %s1108_s6, 0 }
  0xd0   : > { %s409_s17 = sshll.u32 %s1276_s29, 4 }
  0xd1   : > { %s183_s4 = scalar_lea.hbm %s1226_s1, %s409_s17 }
  0xd2   : > { %s677_s8 = scalar_lea.hbm %s183_s4, 16  ;;  %p682_p0 = scmp.lt.s32.totalorder %s183_s4, %s1226_s1 }
  0xd3   : > { %p678_p3 = scmp.ne.s32.totalorder %s183_s4, %s677_s8  ;;  %p683_p1 = scmp.lt.s32.totalorder %s922_s28, %s677_s8 }
  0xd5   : > { %p679_p8 = pnand %p678_p3, %p486_p6  ;;  %p684_p7 = por %p683_p1, %p682_p0 }
  0xd7   : > { %p680_p12 = pneg %p679_p8 }
  0xd9   : > { %p685_p9 = pnand %p684_p7, %p680_p12 }
  0xdb   : > { %688 = shalt.err (!%p685_p9)  }
  0xdc   : > { %s689_s26 = scalar_lea.vmem %s194_s25, 16  ;;  %p696_p11 = scmp.lt.s32.totalorder %s194_s25, %s932_s7 }
  0xdd   : > { %p690_p13 = scmp.ne.s32.totalorder %s194_s25, %s689_s26  ;;  %p697_p2 = scmp.lt.s32.totalorder %s935_s9, %s689_s26 }
  0xdf   : > { %p691_p5 = pnand %p690_p13, %p486_p6  ;;  %p698_p3 = por %p697_p2, %p696_p11 }
  0xe1   : > { %p692_p10 = pneg %p691_p5 }
  0xe3   : > { %p699_p8 = pnand %p698_p3, %p692_p10 }
  0xe5   : > { %702 = shalt.err (!%p699_p8)  }
  0xe6   : > { %467 = dma.hbm_to_vmem [thread:$0]  (%p486_p6), %s183_s4, 16, %s194_s25, [#allocation2 + $0x6] }
  0xe7   : > { %p1235_p12 = scmp.lt.s32.totalorder %s1108_s6, 63 }
  0xe9   : > { %s1278_s3 = smov (!%p1235_p12, %s200_s3), 63 }
  0xea   : > { %s415_s23 = sshll.u32 %s1278_s3, 4 }
  0xeb   : > { %s204_s10 = scalar_lea.hbm %s1226_s1, %s415_s23 }
  0xec   : > { %s703_s30 = scalar_lea.hbm %s204_s10, 16  ;;  %p708_p7 = scmp.lt.s32.totalorder %s204_s10, %s1226_s1 }
  0xed   : > { %p704_p0 = scmp.ne.s32.totalorder %s204_s10, %s703_s30  ;;  %p709_p9 = scmp.lt.s32.totalorder %s922_s28, %s703_s30 }
  0xef   : > { %p705_p2 = pnand %p704_p0, %p486_p6  ;;  %p710_p13 = por %p709_p9, %p708_p7 }
  0xf1   : > { %p706_p1 = pneg %p705_p2 }
  0xf3   : > { %p711_p5 = pnand %p710_p13, %p706_p1 }
  0xf5   : > { %714 = shalt.err (!%p711_p5)  }
  0xf6   : > { %s715_s6 = scalar_lea.vmem %s215_s0, 16  ;;  %p722_p8 = scmp.lt.s32.totalorder %s215_s0, %s932_s7 }
  0xf7   : > { %p716_p10 = scmp.ne.s32.totalorder %s215_s0, %s715_s6  ;;  %p723_p12 = scmp.lt.s32.totalorder %s935_s9, %s715_s6 }
  0xf9   : > { %p717_p11 = pnand %p716_p10, %p486_p6  ;;  %p724_p0 = por %p723_p12, %p722_p8 }
  0xfb   : > { %p718_p3 = pneg %p717_p11 }
  0xfd   : > { %p725_p2 = pnand %p724_p0, %p718_p3 }
  0xff   : > { %728 = shalt.err (!%p725_p2)  }
 0x100   : > { %470 = dma.hbm_to_vmem [thread:$0]  (%p486_p6), %s204_s10, 16, %s215_s0, [#allocation2 + $0x7] }
 0x101   : > { %772 = dma.done.wait (%p486_p6), [#allocation2], 16 }
 0x102   : > { %774 = vsyncadd (%p486_p6), [#allocation2], 4294967280 }
 0x103   : > { %776 = dma.done.wait (%p486_p6), [#allocation2 + $0x1], 16 }
 0x104   : > { %778 = vsyncadd (%p486_p6), [#allocation2 + $0x1], 4294967280 }
 0x105   : > { %780 = dma.done.wait (%p486_p6), [#allocation2 + $0x2], 16 }
 0x106   : > { %782 = vsyncadd (%p486_p6), [#allocation2 + $0x2], 4294967280 }
 0x107   : > { %784 = dma.done.wait (%p486_p6), [#allocation2 + $0x3], 16 }
 0x108   : > { %786 = vsyncadd (%p486_p6), [#allocation2 + $0x3], 4294967280 }
 0x109   : > { %788 = dma.done.wait (%p486_p6), [#allocation2 + $0x4], 16 }
 0x10a   : > { %790 = vsyncadd (%p486_p6), [#allocation2 + $0x4], 4294967280 }
 0x10b   : > { %792 = dma.done.wait (%p486_p6), [#allocation2 + $0x5], 16 }
 0x10c   : > { %794 = vsyncadd (%p486_p6), [#allocation2 + $0x5], 4294967280 }
 0x10d   : > { %796 = dma.done.wait (%p486_p6), [#allocation2 + $0x6], 16 }
 0x10e   : > { %798 = vsyncadd (%p486_p6), [#allocation2 + $0x6], 4294967280 }
 0x10f   : > { %800 = dma.done.wait (%p486_p6), [#allocation2 + $0x7], 16 }
 0x110   : > { %802 = vsyncadd (%p486_p6), [#allocation2 + $0x7], 4294967280  ;;  %s417_s28 = sshll.u32 %s817_s14, 7  ;;  %p1186_p1 = pnand %p486_p6, %p867_p4 }
 0x111   : > { %s247_s5 = scalar_lea.hbm %s1227_s2, %s417_s28  ;;  %s261_s0 = sand.u32 1, %s809_s12  }
 0x112   : > { %s236_s8 = scalar_lea.sflag [#allocation6], %s49_s21  ;;  %s729_s11 = scalar_lea.vmem %s896_s27, 128 }
 0x113   : > { %p730_p9 = scmp.ne.s32.totalorder %s896_s27, %s729_s11  ;;  %p731_p13 = pneg %p1186_p1 }
 0x114   : > { %p738_p11 = scmp.lt.s32.totalorder %s935_s9, %s729_s11  ;;  %p1237_p3 = scmp.lt.s32.totalorder %s896_s27, %s932_s7 }
 0x115   : > { %p732_p5 = pnand %p731_p13, %p730_p9 }
 0x116   : > { %p739_p8 = por %p738_p11, %p1237_p3 }
 0x117   : > { %p733_p10 = pneg %p732_p5 }
 0x119   : > { %p740_p12 = pnand %p739_p8, %p733_p10 }
 0x11b   : > { %743 = shalt.err (!%p740_p12)
}
 0x11c   : > { %s744_s19 = scalar_lea.hbm %s247_s5, 128  ;;  %s749_s12 = scalar_lea.hbm %s1227_s2, 256 }
 0x11d   : > { %p745_p4 = scmp.ne.s32.totalorder %s247_s5, %s744_s19  ;;  %p750_p2 = scmp.lt.s32.totalorder %s247_s5, %s1227_s2 }
 0x11e   : > { %p751_p7 = scmp.lt.s32.totalorder %s749_s12, %s744_s19 }
 0x11f   : > { %p747_p6 = pnand %p745_p4, %p731_p13 }
 0x120   : > { %p752_p9 = por %p751_p7, %p750_p2 }
 0x121   : > { %p748_p0 = pneg %p747_p6 }
 0x123   : > { %p753_p5 = pnand %p752_p9, %p748_p0 }
 0x125   : > { %756 = shalt.err (!%p753_p5)
}
 0x126   : > { %481 = dma.vmem_to_hbm [thread:$0]  (!%p1186_p1), %s896_s27, 128, %s247_s5, %s236_s8  }
 0x127   : > { %p1238_p13 = scmp.ne.s32.totalorder %s1230_s20, 0  ;;  %p1239_p10 = scmp.ge.s32.totalorder %s817_s14, 1 }
 0x128   : > { %s262_s7 = scalar_lea.sflag [#allocation6], %s261_s0 }
 0x129   : > { %p483_p11 = pnand %p1239_p10, %p1238_p13 }
 0x12b   : > { %p484_p3 = pneg %p483_p11 }
 0x12d   : > { %804 = dma.done.wait (%p484_p3), %s262_s7, 128  }
 0x12e   : > { %806 = vsyncadd (%p484_p3), %s262_s7, 4294967168  ;;  %p16_p7 = scmp.ge.s32.totalorder %s856_s15, 3   ;;  %s1240_s12 = smov %s813_s13 }
 0x12f   : > { %s1241_s13 = smov %s865_s18  ;;  %s1242_s14 = smov %s856_s15 }
 0x130   :  { %18 = sbr.rel (!%p16_p7) target bundleno = 8 (0x8), region = 105 }
 0x135   :  { %267 = vsyncpa [#allocation6], 1 }
 0x136   :  { %269 = vsyncpa [#allocation6 + $0x1], 1 }
 0x137   :  { %270 = vsyncmov [#allocation2] }
 0x13a   :  { %s271_s14 = vpop.sfrf %270 }
 0x13b   :  { %p420_p1 = scmp.ne.s32.totalorder %s271_s14, 0 }
 0x13d   :  { %275 = shalt.err (%p420_p1)  }
 0x13e   :  { %277 = vsyncmov [#allocation2 + $0x1] }
 0x141   :  { %s278_s20 = vpop.sfrf %277 }
 0x142   :  { %p421_p8 = scmp.ne.s32.totalorder %s278_s20, 0 }
 0x144   :  { %282 = shalt.err (%p421_p8)  }
 0x145   :  { %284 = vsyncmov [#allocation2 + $0x2] }
 0x148   :  { %s285_s27 = vpop.sfrf %284 }
 0x149   :  { %p422_p12 = scmp.ne.s32.totalorder %s285_s27, 0 }
 0x14b   :  { %289 = shalt.err (%p422_p12)  }
 0x14c   :  { %291 = vsyncmov [#allocation2 + $0x3] }
 0x14f   :  { %s292_s9 = vpop.sfrf %291 }
 0x150   :  { %p423_p4 = scmp.ne.s32.totalorder %s292_s9, 0 }
 0x152   :  { %296 = shalt.err (%p423_p4)  }
 0x153   :  { %298 = vsyncmov [#allocation2 + $0x4] }
 0x156   :  { %s299_s15 = vpop.sfrf %298 }
 0x157   :  { %p424_p6 = scmp.ne.s32.totalorder %s299_s15, 0 }
 0x159   :  { %303 = shalt.err (%p424_p6)  }
 0x15a   :  { %305 = vsyncmov [#allocation2 + $0x5] }
 0x15d   :  { %s306_s1 = vpop.sfrf %305 }
 0x15e   :  { %p425_p0 = scmp.ne.s32.totalorder %s306_s1, 0 }
 0x160   :  { %310 = shalt.err (%p425_p0)  }
 0x161   :  { %312 = vsyncmov [#allocation2 + $0x6] }
 0x164   :  { %s313_s2 = vpop.sfrf %312 }
 0x165   :  { %p426_p2 = scmp.ne.s32.totalorder %s313_s2, 0 }
 0x167   :  { %317 = shalt.err (%p426_p2)  }
 0x168   :  { %319 = vsyncmov [#allocation2 + $0x7] }
 0x16b   :  { %s320_s13 = vpop.sfrf %319 }
 0x16c   :  { %p427_p9 = scmp.ne.s32.totalorder %s320_s13, 0 }
 0x16e   :  { %324 = shalt.err (%p427_p9)  }

</bundles_post_ra>
